<compile_context>
chip_gen: v5e
topology: v5e:2x2
jax: 0.10.0
libtpu: 0.0.40
codegen_flags: <defaults>
</compile_context>

<pallas_src>
import functools

import jax
import jax.numpy as jnp
from jax.experimental import pallas as pl
from jax.experimental.pallas import tpu as pltpu


# ---------------------------------------------------------------------------
# Pass A: conv-as-matmul (Y^T = W @ P^T) + per-channel sum / sum-of-squares
# accumulated across all M tiles into grid-resident output blocks.
# ---------------------------------------------------------------------------
def _conv_stats_kernel(pt_ref, w_ref, y_ref, sum_ref, sq_ref):
    # pt_ref : (K, tile_m)   bf16 transposed im2col patches (M on lanes)
    # w_ref  : (OC, K)       bf16 conv weight
    # y_ref  : (OC, tile_m)  f32 conv output tile (lane-dense store)
    # sum_ref, sq_ref : (OC, 1) f32 accumulators, resident across the grid
    i = pl.program_id(0)

    y = jnp.dot(w_ref[...], pt_ref[...], preferred_element_type=jnp.float32)
    y_ref[...] = y

    @pl.when(i == 0)
    def _():
        sum_ref[...] = jnp.zeros_like(sum_ref)
        sq_ref[...] = jnp.zeros_like(sq_ref)

    sum_ref[...] += jnp.sum(y, axis=1, keepdims=True)
    sq_ref[...] += jnp.sum(y * y, axis=1, keepdims=True)


# ---------------------------------------------------------------------------
# Pass B: folded BatchNorm affine (per-channel scale/shift) + ReLU.
# ---------------------------------------------------------------------------
def _bn_relu_kernel(y_ref, scale_ref, shift_ref, o_ref):
    # y_ref: (OC, tile_m) f32; scale/shift: (OC, 1) f32 broadcast over lanes
    o_ref[...] = jnp.maximum(y_ref[...] * scale_ref[...] + shift_ref[...], 0.0)


# ---------------------------------------------------------------------------
# Wrapper-side im2col producing the TRANSPOSED patch matrix (K, M_pad) with
# K = C*KH*KW flattened in (c, kh, kw) order (matches weight.reshape(OC, K))
# and M flattened in (n, oh, ow) order.  M is zero-padded to tile_m multiple.
# ---------------------------------------------------------------------------
def _im2col_t(x, kernel_size, stride, dilation, padding, tile_m):
    n, c, h, w = x.shape
    kh = kw = kernel_size
    oh = (h + 2 * padding - dilation * (kh - 1) - 1) // stride + 1
    ow = (w + 2 * padding - dilation * (kw - 1) - 1) // stride + 1
    xp = jnp.pad(x, ((0, 0), (0, 0), (padding, padding), (padding, padding)))
    taps = []
    for i in range(kh):
        for j in range(kw):
            hi = i * dilation
            wj = j * dilation
            taps.append(
                xp[:, :, hi:hi + (oh - 1) * stride + 1:stride,
                         wj:wj + (ow - 1) * stride + 1:stride])   # (N,C,OH,OW)
    col = jnp.stack(taps, axis=2)                   # (N, C, KH*KW, OH, OW)
    k = c * kh * kw
    m = n * oh * ow
    col = col.reshape(n, k, oh * ow)                # (N, K, OH*OW)
    col = col.transpose(1, 0, 2).reshape(k, m)      # (K, M)
    m_pad = pl.cdiv(m, tile_m) * tile_m
    if m_pad != m:
        col = jnp.pad(col, ((0, 0), (0, m_pad - m)))
    return col, oh, ow, m, m_pad


def conv_block_forward(x, conv_w, conv_b, bn_gamma, bn_beta, *,
                       kernel_size, stride, dilation, padding,
                       eps=0.001, tile_m=256):
    """x: (N, C, H, W) f32 -> (N, OC, OH, OW) f32.

    tile_m must be a multiple of 128; sweep 512-2048 for large shapes (sized
    against v7x's 64 MiB VMEM — trivially fits here since K, OC are small).
    """
    del conv_b  # exactly cancelled by train-mode BatchNorm mean subtraction

    n = x.shape[0]
    oc = conv_w.shape[0]

    pt, oh, ow, m, m_pad = _im2col_t(
        x, kernel_size, stride, dilation, padding, tile_m)
    k = pt.shape[0]
    grid_m = m_pad // tile_m

    # bf16 MXU inputs, f32 accumulation (v6e/v7x MXU headroom; fine on v5e).
    pt_bf = pt.astype(jnp.bfloat16)
    w_bf = conv_w.reshape(oc, k).astype(jnp.bfloat16)

    vmem_cap = 32 * 1024 * 1024  # safe scoped-VMEM limit on v5e/v6e/v7x

    # ---------------- pass A: conv + BN statistics --------------------------
    bytes_a = pt_bf.size * 2 + w_bf.size * 2 + oc * m_pad * 4 + 2 * oc * 4
    y_t, s1, s2 = pl.pallas_call(
        _conv_stats_kernel,
        out_shape=(
            jax.ShapeDtypeStruct((oc, m_pad), jnp.float32),   # Y^T
            jax.ShapeDtypeStruct((oc, 1), jnp.float32),       # sum_c
            jax.ShapeDtypeStruct((oc, 1), jnp.float32),       # sumsq_c
        ),
        grid_spec=pltpu.PrefetchScalarGridSpec(
            num_scalar_prefetch=0,
            grid=(grid_m,),
            in_specs=[
                pl.BlockSpec((k, tile_m), lambda i: (0, i)),
                pl.BlockSpec((oc, k), lambda i: (0, 0)),
            ],
            out_specs=(
                pl.BlockSpec((oc, tile_m), lambda i: (0, i)),
                pl.BlockSpec((oc, 1), lambda i: (0, 0)),      # resident accum
                pl.BlockSpec((oc, 1), lambda i: (0, 0)),      # resident accum
            ),
        ),
        compiler_params=pltpu.CompilerParams(
            dimension_semantics=("arbitrary",),               # reduction axis
            vmem_limit_bytes=vmem_cap),
        cost_estimate=pl.CostEstimate(
            flops=2 * m_pad * k * oc, transcendentals=0,
            bytes_accessed=bytes_a),
    )(pt_bf, w_bf)

    # Fold BN (batch stats, biased variance) + gamma/beta into scale/shift.
    inv_m = 1.0 / float(m)                     # divide by TRUE row count
    mean = s1 * inv_m                          # (OC, 1)
    var = jnp.maximum(s2 * inv_m - mean * mean, 0.0)
    scale = bn_gamma.reshape(oc, 1) * jax.lax.rsqrt(var + eps)
    shift = bn_beta.reshape(oc, 1) - mean * scale

    # ---------------- pass B: normalize + ReLU ------------------------------
    bytes_b = 2 * oc * m_pad * 4 + 2 * oc * 4
    out_t = pl.pallas_call(
        _bn_relu_kernel,
        out_shape=jax.ShapeDtypeStruct((oc, m_pad), jnp.float32),
        grid_spec=pltpu.PrefetchScalarGridSpec(
            num_scalar_prefetch=0,
            grid=(grid_m,),
            in_specs=[
                pl.BlockSpec((oc, tile_m), lambda i: (0, i)),
                pl.BlockSpec((oc, 1), lambda i: (0, 0)),
                pl.BlockSpec((oc, 1), lambda i: (0, 0)),
            ],
            out_specs=pl.BlockSpec((oc, tile_m), lambda i: (0, i)),
        ),
        compiler_params=pltpu.CompilerParams(
            dimension_semantics=("parallel",),                # megacore on v7x
            vmem_limit_bytes=vmem_cap),
        cost_estimate=pl.CostEstimate(
            flops=2 * oc * m_pad, transcendentals=0, bytes_accessed=bytes_b),
    )(y_t, scale, shift)

    out_t = out_t[:, :m]                                      # drop M padding
    return out_t.reshape(oc, n, oh, ow).transpose(1, 0, 2, 3)


if __name__ == "__main__":
    # Module hyperparameters (small, consistent with ConvBlock.__init__)
    in_channels, out_channels = 4, 8
    kernel_size, stride, dilation, padding = 3, 1, 1, 1
    N, H, W = 2, 16, 16

    key = jax.random.PRNGKey(0)
    kx, kw_, kb = jax.random.split(key, 3)

    x = jax.random.normal(kx, (N, in_channels, H, W), dtype=jnp.float32)

    fan_in = in_channels * kernel_size * kernel_size
    conv_w = jax.random.normal(
        kw_, (out_channels, in_channels, kernel_size, kernel_size),
        dtype=jnp.float32) * (1.0 / jnp.sqrt(fan_in))
    conv_b = jax.random.normal(kb, (out_channels,), dtype=jnp.float32) * 0.1
    bn_gamma = jnp.ones((out_channels,), dtype=jnp.float32)
    bn_beta = jnp.zeros((out_channels,), dtype=jnp.float32)

    out = conv_block_forward(
        x, conv_w, conv_b, bn_gamma, bn_beta,
        kernel_size=kernel_size, stride=stride,
        dilation=dilation, padding=padding, eps=0.001, tile_m=256)
    out = jax.block_until_ready(out)

    assert out.shape == (N, out_channels, H, W)
    assert bool(jnp.all(jnp.isfinite(out)))

    # Pure-JAX reference (Conv2d + train-mode BN + ReLU); loose tolerance for
    # the bf16 MXU inputs.
    ref = jax.lax.conv_general_dilated(
        x, conv_w, window_strides=(stride, stride),
        padding=[(padding, padding), (padding, padding)],
        rhs_dilation=(dilation, dilation),
        dimension_numbers=("NCHW", "OIHW", "NCHW"))
    ref = ref + conv_b.reshape(1, -1, 1, 1)
    mu = ref.mean(axis=(0, 2, 3), keepdims=True)
    va = ((ref - mu) ** 2).mean(axis=(0, 2, 3), keepdims=True)
    ref = (ref - mu) * jax.lax.rsqrt(va + 0.001)
    ref = jnp.maximum(ref * bn_gamma.reshape(1, -1, 1, 1)
                      + bn_beta.reshape(1, -1, 1, 1), 0.0)
    assert bool(jnp.allclose(out, ref, atol=0.1, rtol=0.1))

    print("KERNEL_OK")
</pallas_src>

<mosaic_0001>
module attributes {stable_mosaic.version = 11 : i64} {
  func.func @_conv_stats_kernel(%arg0: i32, %arg1: memref<36x256xbf16, #tpu.memory_space<vmem>>, %arg2: memref<8x36xbf16, #tpu.memory_space<vmem>>, %arg3: memref<8x256xf32, #tpu.memory_space<vmem>>, %arg4: memref<8x1xf32, #tpu.memory_space<vmem>>, %arg5: memref<8x1xf32, #tpu.memory_space<vmem>>) attributes {dimension_semantics = [#tpu.dimension_semantics<arbitrary>], iteration_bounds = array<i64: 2>, scalar_prefetch = 0 : i64, scratch_operands = 0 : i64, tpu.core_type = #tpu.core_type<tc>, window_params = [{transform_indices = @transform_0, window_bounds = array<i64: 36, 256>}, {pipeline_mode = #tpu.pipeline_mode<synchronous>, transform_indices = @transform_1, window_bounds = array<i64: 8, 36>}, {transform_indices = @transform_2, window_bounds = array<i64: 8, 256>}, {pipeline_mode = #tpu.pipeline_mode<synchronous>, transform_indices = @transform_3, window_bounds = array<i64: 8, 1>}, {pipeline_mode = #tpu.pipeline_mode<synchronous>, transform_indices = @transform_4, window_bounds = array<i64: 8, 1>}]} {
    %c0 = arith.constant 0 : index
    %c0_0 = arith.constant 0 : index
    %0 = vector.load %arg2[%c0, %c0_0] : memref<8x36xbf16, #tpu.memory_space<vmem>>, vector<8x36xbf16>
    %c0_1 = arith.constant 0 : index
    %c0_2 = arith.constant 0 : index
    %1 = vector.load %arg1[%c0_1, %c0_2] : memref<36x256xbf16, #tpu.memory_space<vmem>>, vector<36x256xbf16>
    %cst = arith.constant dense<0.000000e+00> : vector<8x256xf32>
    %2 = tpu.matmul %0, %1, %cst {dimension_numbers = #tpu.dot_dimension_numbers<[1], [0], [0], [1], [0, 0, 1, 1], [], []>} : vector<8x36xbf16>, vector<36x256xbf16>, vector<8x256xf32> -> vector<8x256xf32>
    %c0_3 = arith.constant 0 : index
    %c0_4 = arith.constant 0 : index
    %3 = vector.load %arg3[%c0_3, %c0_4] : memref<8x256xf32, #tpu.memory_space<vmem>>, vector<8x256xf32>
    tpu.vector_store %arg3[%c0_3, %c0_4], %2 {strides = array<i32>} : memref<8x256xf32, #tpu.memory_space<vmem>>, vector<8x256xf32>,
    %c0_i32 = arith.constant 0 : i32
    %4 = arith.cmpi eq, %arg0, %c0_i32 : i32
    %5 = arith.extui %4 : i1 to i32
    %c0_i32_5 = arith.constant 0 : i32
    %6 = arith.cmpi ne, %5, %c0_i32_5 : i32
    scf.if %6 {
      %cst_16 = arith.constant 0.000000e+00 : f32
      %18 = vector.broadcast %cst_16 : f32 to vector<8x1xf32>
      %c0_17 = arith.constant 0 : index
      %c0_18 = arith.constant 0 : index
      %19 = vector.load %arg4[%c0_17, %c0_18] : memref<8x1xf32, #tpu.memory_space<vmem>>, vector<8x1xf32>
      tpu.vector_store %arg4[%c0_17, %c0_18], %18 {strides = array<i32>} : memref<8x1xf32, #tpu.memory_space<vmem>>, vector<8x1xf32>,
      %cst_19 = arith.constant 0.000000e+00 : f32
      %20 = vector.broadcast %cst_19 : f32 to vector<8x1xf32>
      %c0_20 = arith.constant 0 : index
      %c0_21 = arith.constant 0 : index
      %21 = vector.load %arg5[%c0_20, %c0_21] : memref<8x1xf32, #tpu.memory_space<vmem>>, vector<8x1xf32>
      tpu.vector_store %arg5[%c0_20, %c0_21], %20 {strides = array<i32>} : memref<8x1xf32, #tpu.memory_space<vmem>>, vector<8x1xf32>,
    } else {
    }
    %c0_6 = arith.constant 0 : index
    %c0_7 = arith.constant 0 : index
    %7 = vector.load %arg4[%c0_6, %c0_7] : memref<8x1xf32, #tpu.memory_space<vmem>>, vector<8x1xf32>
    %cst_8 = arith.constant dense<0.000000e+00> : vector<8xf32>
    %8 = vector.multi_reduction <add>, %2, %cst_8 [1] : vector<8x256xf32> to vector<8xf32>
    %9 = vector.shape_cast %8 : vector<8xf32> to vector<8x1xf32>
    %10 = arith.addf %7, %9 : vector<8x1xf32>
    %c0_9 = arith.constant 0 : index
    %c0_10 = arith.constant 0 : index
    %11 = vector.load %arg4[%c0_9, %c0_10] : memref<8x1xf32, #tpu.memory_space<vmem>>, vector<8x1xf32>
    tpu.vector_store %arg4[%c0_9, %c0_10], %10 {strides = array<i32>} : memref<8x1xf32, #tpu.memory_space<vmem>>, vector<8x1xf32>,
    %c0_11 = arith.constant 0 : index
    %c0_12 = arith.constant 0 : index
    %12 = vector.load %arg5[%c0_11, %c0_12] : memref<8x1xf32, #tpu.memory_space<vmem>>, vector<8x1xf32>
    %13 = arith.mulf %2, %2 : vector<8x256xf32>
    %cst_13 = arith.constant dense<0.000000e+00> : vector<8xf32>
    %14 = vector.multi_reduction <add>, %13, %cst_13 [1] : vector<8x256xf32> to vector<8xf32>
    %15 = vector.shape_cast %14 : vector<8xf32> to vector<8x1xf32>
    %16 = arith.addf %12, %15 : vector<8x1xf32>
    %c0_14 = arith.constant 0 : index
    %c0_15 = arith.constant 0 : index
    %17 = vector.load %arg5[%c0_14, %c0_15] : memref<8x1xf32, #tpu.memory_space<vmem>>, vector<8x1xf32>
    tpu.vector_store %arg5[%c0_14, %c0_15], %16 {strides = array<i32>} : memref<8x1xf32, #tpu.memory_space<vmem>>, vector<8x1xf32>,
    return
  }
  func.func @transform_0(%arg0: i32) -> (i32, i32) {
    %c0_i32 = arith.constant 0 : i32
    %c0_i32_0 = arith.constant 0 : i32
    return %c0_i32, %arg0 : i32, i32
  }
  func.func @transform_1(%arg0: i32) -> (i32, i32) {
    %c0_i32 = arith.constant 0 : i32
    %c0_i32_0 = arith.constant 0 : i32
    %c0_i32_1 = arith.constant 0 : i32
    return %c0_i32, %c0_i32_0 : i32, i32
  }
  func.func @transform_2(%arg0: i32) -> (i32, i32) {
    %c0_i32 = arith.constant 0 : i32
    %c0_i32_0 = arith.constant 0 : i32
    return %c0_i32, %arg0 : i32, i32
  }
  func.func @transform_3(%arg0: i32) -> (i32, i32) {
    %c0_i32 = arith.constant 0 : i32
    %c0_i32_0 = arith.constant 0 : i32
    %c0_i32_1 = arith.constant 0 : i32
    return %c0_i32, %c0_i32_0 : i32, i32
  }
  func.func @transform_4(%arg0: i32) -> (i32, i32) {
    %c0_i32 = arith.constant 0 : i32
    %c0_i32_0 = arith.constant 0 : i32
    %c0_i32_1 = arith.constant 0 : i32
    return %c0_i32, %c0_i32_0 : i32, i32
  }
}

</mosaic_0001>

<bundles_post_ra>
// kernel: tpu_custom_call.1
= control target key start
LH: loop header
LB: loop body
LE: loop exit
PB: predicated region body
PF: predicated region fallthrough
CT: control target
= control target key end

     0   :  { %s860_s0 = inlined_call_operand.hbm [shape: bf16[36,512], index: 0, kind: input, shape index: {}]   ;;  %s861_s1 = inlined_call_operand.hbm [shape: bf16[8,36], index: 1, kind: input, shape index: {}]   ;;  %s862_s2 = inlined_call_operand.hbm [shape: f32[8,512], index: 2, kind: output, shape index: {0}]   ;;  %s863_s3 = inlined_call_operand.vmem [shape: f32[8,1], index: 3, kind: output, shape index: {1}]   ;;  %s864_s4 = inlined_call_operand.vmem [shape: f32[8,1], index: 4, kind: output, shape index: {2}]  }
   0x1   :  { %865 = sst [smem:[#allocation11_spill]] %s861_s1 }
   0x2   :  { %10 = vsyncpa [#allocation3], 0 }
   0x3   :  { %12 = vsyncpa [#allocation3 + $0x1], 0 }
   0x4   :  { %13 = vsyncpa [#allocation6], 0 }
   0x5   :  { %14 = vsyncpa [#allocation4], 0 }
   0x6   :  { %16 = vsyncpa [#allocation4 + $0x1], 0  ;;  %s696_s15 = smov 0   ;;  %s698_s16 = smov 0  }
   0x7   :  { %s700_s17 = smov 0   ;;  %s702_s18 = smov 0  }
   0x8 LB: > { %s717_s19 = sadd.s32 4294967295, %s664_s18   ;;  %s432_s20 = sadd.s32 4294967294, %s664_s18   ;;  %s664_s18 = sphi %s702_s18, %s878_s18   ;;  %s660_s17 = sphi %s700_s17, %s877_s17   ;;  %s656_s16 = sphi %s698_s16, %s876_s16   ;;  %s652_s15 = sphi %s696_s15, %s875_s15  }
   0x9   : > { %s721_s21 = sadd.s32 1, %s664_s18   ;;  %s29_s22 = sadd.s32 1, %s660_s17 }
   0xa   : > { %s26_s23 = ssub.s32 %s664_s18, %s721_s21  ;;  %p36_p0 = scmp.ne.s32.totalorder %s660_s17, %s656_s16 }
   0xb   : > { %p27_p1 = scmp.eq.s32.totalorder %s26_s23, 0  ;;  %p37_p2 = scmp.eq.s32.totalorder %s664_s18, 0 }
   0xc   : > { %p42_p3 = scmp.ne.s32.totalorder %s656_s16, %s652_s15  ;;  %p43_p4 = scmp.eq.s32.totalorder %s717_s19, 0 }
   0xd   : > { %s733_s24 = scalar_select %p27_p1, %s660_s17, %s29_s22  }
   0xe   : > { %p735_p5 = por %p37_p2, %p36_p0  ;;  %p741_p6 = por %p43_p4, %p42_p3 }
   0xf   : > { %p87_p7 = scmp.eq.s32.totalorder %s717_s19, 1  ;;  %p93_p8 = scmp.eq.s32.totalorder %s432_s20, 1 }
  0x10   : > { %p433_p9 = scmp.ge.s32.totalorder %s664_s18, 1  ;;  %p142_p10 = scmp.lt.s32.totalorder %s664_s18, 3 }
  0x11   : > { %p748_p11 = por %p87_p7, %p36_p0  ;;  %p752_p12 = por %p93_p8, %p42_p3 }
  0x12   : > { %p756_p13 = pnand %p433_p9, %p142_p10  ;;  %s871_s1 = sld [smem:[#allocation11_spill]] }
  0x13   : > { %s666_s7 = smov [#allocation5]   ;;  %p494_p7 = scmp.lt.s32.totalorder %s664_s18, 2 }
  0x14   : > { %p481_p0 = pneg %p756_p13  ;;  %s156_s8 = sshll.u32 %s666_s7, 4  ;;  %s157_s8 = int_to_ptr.vmem [resolvable:$true] %s156_s8 }
  0x15   : > { %s167_s9 = sand.u32 1, %s660_s17   ;;  %p773_p8 = pnand %p494_p7, %p735_p5 }
  0x16   : > { %p482_p3 = pnand %p481_p0, %p43_p4  ;;  %s471_s11 = smul.u32 40, %s167_s9 }
  0x17   : > { %s465_s12 = sshll.u32 %s664_s18, 3  ;;  %s168_s5 = scalar_lea.sflag [#allocation3], %s167_s9 }
  0x18   : > { %s154_s6 = sshll.u32 %s871_s1, 4  ;;  %s176_s20 = scalar_lea.hbm %s860_s0, %s465_s12  ;;  %s155_s6 = int_to_ptr.hbm [resolvable:$true] %s154_s6 }
  0x19   : > { %484 = dma.hbm_to_vmem [thread:$0]  (!%p482_p3), %s155_s6, 64, %s157_s8, [#allocation6]  }
  0x1a   : > { %s171_s22 = scalar_lea.vmem [#allocation2], %s471_s11  ;;  %s177_s30 = sshll.u32 %s176_s20, 4  ;;  %s178_s30 = int_to_ptr.hbm [resolvable:$true] %s177_s30 }
  0x1b   : > { %s179_s23 = sshll.u32 %s171_s22, 4  ;;  %s564_s7 = sshra.s32 %s178_s30, 4  ;;  %s180_s23 = int_to_ptr.vmem [resolvable:$true] %s179_s23  ;;  %s565_s7 = int_to_ptr.hbm [resolvable:$true] %s564_s7 }
  0x1c   : > { %s566_s25 = scalar_lea.hbm %s565_s7, 40  ;;  %p568_p9 = pneg %p773_p8 }
  0x1d   : > { %p567_p5 = scmp.ne.s32.totalorder %s565_s7, %s566_s25  ;;  %s571_s1 = scalar_lea.hbm %s860_s0, 80 }
  0x1e   : > { %p572_p3 = scmp.lt.s32.totalorder %s565_s7, %s860_s0  ;;  %p573_p7 = scmp.lt.s32.totalorder %s571_s1, %s566_s25 }
  0x1f   : > { %p569_p10 = pnand %p568_p9, %p567_p5 }
  0x20   : > { %p574_p2 = por %p573_p7, %p572_p3 }
  0x21   : > { %p570_p0 = pneg %p569_p10 }
  0x23   : > { %p575_p1 = pnand %p574_p2, %p570_p0 }
  0x25   : > { %578 = shalt.err (!%p575_p1)
}
  0x26   : > { %s667_s9 = smov 256   ;;  %s668_s11 = smov 128  }
  0x27   : > { %s669_s14 = smov 8   ;;  %191 = sbr.rel (%p756_p13) target bundleno = 337 (0x151), region = 28 }
  0x28   : > { %488 = dma.hbm_to_vmem [thread:$0]  (!%p773_p8), %s178_s30, 640, %s180_s23, %s168_s5, %s667_s9, %s668_s11, %s669_s14  }
  0x29   : > { %s794_s20 = sand.u32 (!%p756_p13), 1, %s656_s16  }
  0x2a   : > { %s472_s22 = smul.u32 (!%p756_p13), 40, %s794_s20  ;;  %s194_s1 = scalar_lea.sflag (!%p756_p13), [#allocation3], %s794_s20 }
  0x2c   : > { %s197_s7 = scalar_lea.vmem [#allocation2], %s472_s22 }
  0x2d   : > { %639 = dma.done.wait (%p741_p6), %s194_s1, 640  }
  0x2e   : > { %641 = vsyncadd (%p741_p6), %s194_s1, 4294966656 }
  0x2f   : > { %643 = dma.done.wait (%p43_p4), [#allocation6], 64  }
  0x30   : > { %645 = vsyncadd (%p43_p4), [#allocation6], 4294967232  ;;  %v236_v0 = vld [vmem:[%s197_s7 + $0x20] sm:$0x33]  ;;  %vm266_vm0 = vcmask 1041408   ;;  %vm262_vm1 = vcmask 293888  }
  0x31   : > { %v250_v1 = vunpack.c.l.b16 %v236_v0  ;;  %v251_v2 = vunpack.c.h.b16 %v236_v0  ;;  %v451_v3 = vld [vmem:[%s197_s7 + $0x10] sm:$0xf]  ;;  %v469_v6 = vld [vmem:[%s197_s7 + $0x14] sm:$0xf0]  ;;  %v468_v7 = vld [vmem:[%s197_s7 + $0x14] sm:$0xf] }
  0x32   : > { %v453_v8 = vld [vmem:[%s197_s7 + $0x18] sm:$0xf0]  ;;  %v452_v11 = vor.u32 %v469_v6, %v451_v3  ;;  %v443_v13 = vld [vmem:[%s197_s7] sm:$0xf]  ;;  %v467_v14 = vld [vmem:[%s197_s7 + $0x4] sm:$0xf0] }
  0x33   : > { %v256_v4 = vpack.c.b16 %v250_v1, %v250_v1  ;;  %v257_v5 = vpack.c.b16 %v251_v2, %v251_v2  ;;  %v456_v12 = vor.u32 %v468_v7, %v453_v8  ;;  %v466_v15 = vld [vmem:[%s197_s7 + $0x4] sm:$0xf]  ;;  %v445_v16 = vld [vmem:[%s197_s7 + $0x8] sm:$0xf0]  ;;  %v444_v17 = vor.u32 %v467_v14, %v443_v13  ;;  %v231_v19 = vld [vmem:[#allocation5] sm:$0xf] }
  0x34   : > { %v448_v18 = vor.u32 %v466_v15, %v445_v16  ;;  %s440_s26 = sshll.u32 %s794_s20, 4  ;;  %p873_p4 = scmp.ne.s32.totalorder %s717_s19, 0 }
  0x35   : > { %v268_v9 = vsel %vm266_vm0, %v256_v4, 0  ;;  %v271_v10 = vsel %vm266_vm0, %v257_v5, 0  ;;  %s223_s29 = scalar_lea.vmem [#allocation7], %s440_s26 }
  0x36   : > { %278 = vmatpush.bf16.msra.mxu0 %v268_v9  ;;  %291 = vmatpush.bf16.msra.mxu1 %v271_v10 }
  0x3a   : > { %279 = vmatpush.bf16.msra.mxu0 %v452_v11  ;;  %292 = vmatpush.bf16.msra.mxu1 %v456_v12 }
  0x3e   : > { %280 = vmatpush.bf16.msra.mxu0 %v444_v17  ;;  %293 = vmatpush.bf16.msra.mxu1 %v448_v18 }
  0x41   : > { %457 = vmatmul.msk.bf16.vlgmr.msra.gmra.mxu0 %vm262_vm1, %v231_v19  ;;  %458 = vmatmul.msk.bf16.vlgmr.msra.gmra.mxu1 %vm262_vm1, %v231_v19 }
  0xbe   : > { %v282_v20 = vpop.f32.mrf.mxu0  ;;  %v295_v21 = vpop.f32.mrf.mxu1 }
  0xbf   : > { %299 = vst [vmem:[%s223_s29] sm:$0xff] %v282_v20 }
  0xc0   : > { %300 = vst [vmem:[%s223_s29 + $0x8] sm:$0xff] %v295_v21 }
  0xc2   : > { %304 = sbr.rel (%p873_p4) target bundleno = 202 (0xca), region = 40 }
  0xc6   : > { %v284_v22 = vpop.f32.mrf.mxu0  ;;  %v297_v23 = vpop.f32.mrf.mxu1 }
  0xc7   : > { %vm305_vm2 = vcmask 7168   ;;  %v670_v24 = vmov 0.0  }
  0xc8   : > { %306 = vst.msk [vmem:[%s863_s3] sm:$0xff] %vm305_vm2, %v670_v24 }
  0xc9   : > { %307 = vst.msk [vmem:[%s864_s4] sm:$0xff] %vm305_vm2, %v670_v24 }
  0xca PF: > { %v309_v25 = vadd.f32 %v295_v21, %v282_v20  ;;  %s470_s25 = sshll.u32 %s717_s19, 4  ;;  %s337_s12 = sshll.u32 %s223_s29, 4  ;;  %v316_v26 = vmul.f32 %v282_v20, %v282_v20  ;;  %v317_v27 = vmul.f32 %v295_v21, %v295_v21  ;;  %s338_s12 = int_to_ptr.vmem [resolvable:$true] %s337_s12 }
  0xcb   : > { %s335_s13 = scalar_lea.hbm %s862_s2, %s470_s25  ;;  %s324_s11 = scalar_lea.sflag [#allocation4], %s794_s20 }
  0xcc   : > { %310 = vadd.xlane.f32.xlu0 %v309_v25  ;;  %s339_s9 = sshll.u32 %s335_s13, 4  ;;  %s614_s7 = scalar_lea.hbm %s862_s2, 32  ;;  %s340_s9 = int_to_ptr.hbm [resolvable:$true] %s339_s9 }
  0xcd   : > { %s608_s14 = sshra.s32 %s340_s9, 4  ;;  %s609_s14 = int_to_ptr.hbm [resolvable:$true] %s608_s14 }
  0xce   : > { %s610_s22 = scalar_lea.hbm %s609_s14, 16  ;;  %p615_p2 = scmp.lt.s32.totalorder %s609_s14, %s862_s2 }
  0xcf   : > { %p611_p6 = scmp.ne.s32.totalorder %s609_s14, %s610_s22  ;;  %p616_p8 = scmp.lt.s32.totalorder %s614_s7, %s610_s22 }
  0xd1   : > { %p612_p13 = pnand %p611_p6, %p748_p11  ;;  %p617_p5 = por %p616_p8, %p615_p2 }
  0xd3   : > { %p613_p1 = pneg %p612_p13 }
  0xd5   : > { %p618_p9 = pnand %p617_p5, %p613_p1 }
  0xd7   : > { %621 = shalt.err (!%p618_p9)
}
  0xd8   : > { %479 = dma.vmem_to_hbm [thread:$0]  (%p748_p11), %s338_s12, 256, %s340_s9, %s324_s11   ;;  %v318_v28 = vadd.f32 %v317_v27, %v316_v26  ;;  %v308_v29 = vld [vmem:[%s863_s3] sm:$0xff]  ;;  %vm313_vm3 = vcmask 7168  }
  0xd9   : > { %v315_v32 = vld [vmem:[%s864_s4] sm:$0xff] }
  0xda   : > { %319 = vadd.xlane.f32.xlu0 %v318_v28 }
 0x13f   : > { %v311_v30 = vpop.xlane.xlu0 %310 }
 0x140   : > { %v312_v31 = vadd.f32 %v311_v30, %v308_v29 }
 0x142   : > { %314 = vst.msk [vmem:[%s863_s3] sm:$0xff] %vm313_vm3, %v312_v31 }
 0x14d   : > { %v320_v33 = vpop.xlane.xlu0 %319 }
 0x14e   : > { %v321_v34 = vadd.f32 %v320_v33, %v315_v32 }
 0x150   : > { %322 = vst.msk [vmem:[%s864_s4] sm:$0xff] %vm313_vm3, %v321_v34 }
 0x151 PF: > { %s363_s8 = sand.u32 1, %s652_s15   ;;  %p874_p11 = scmp.ge.s32.totalorder %s664_s18, 2 }
 0x152   : > { %s364_s13 = scalar_lea.sflag [#allocation4], %s363_s8 }
 0x153   : > { %p490_p10 = pnand %p874_p11, %p752_p12 }
 0x155   : > { %p491_p0 = pneg %p490_p10 }
 0x157   : > { %647 = dma.done.wait (%p491_p0), %s364_s13, 256  }
 0x158   : > { %649 = vsyncadd (%p491_p0), %s364_s13, 4294967040  ;;  %p19_p3 = scmp.ge.s32.totalorder %s721_s21, 4   ;;  %s875_s15 = smov %s656_s16 }
 0x159   : > { %s876_s16 = smov %s660_s17  ;;  %s877_s17 = smov %s733_s24 }
 0x15a   : > { %s878_s18 = smov %s721_s21  ;;  %21 = sbr.rel (!%p19_p3) target bundleno = 8 (0x8), region = 97 }
 0x15f   :  { %370 = vsyncpa [#allocation3], 1 }
 0x160   :  { %372 = vsyncpa [#allocation3 + $0x1], 1 }
 0x161   :  { %373 = vsyncpa [#allocation6], 1 }
 0x162   :  { %374 = vsyncpa [#allocation4], 1 }
 0x163   :  { %376 = vsyncpa [#allocation4 + $0x1], 1 }

</bundles_post_ra>
